<compile_context>
chip_gen: v7x
topology: tpu7x:2x2x1
jax: 0.10.0
libtpu: 0.0.40
codegen_flags: <defaults>
</compile_context>

<pallas_src>
from functools import partial

import jax
import jax.numpy as jnp
from jax.experimental import pallas as pl
from jax.experimental.pallas import tpu as pltpu

P_DROP = 0.3
_LANES = 512            # lane-dense last dim (multiple of 128)
_MAX_BLOCK_ROWS = 1024  # 1024 x 512 x 4 B = 2 MiB per f32 block


def _dropout_kernel(seed_ref, x_ref, o_ref, *, threshold, scale, block_rows, lanes):
    shape = x_ref.shape  # (block_rows, lanes)

    # Global element index of every entry in this tile.
    row = jax.lax.broadcasted_iota(jnp.int32, shape, 0).astype(jnp.uint32)
    col = jax.lax.broadcasted_iota(jnp.int32, shape, 1).astype(jnp.uint32)
    base_row = (pl.program_id(0) * block_rows).astype(jnp.uint32)
    idx = (base_row + row) * jnp.uint32(lanes) + col

    # Counter-based PRNG: murmur3 finalizer over (seed, element index).
    # Stateless -> grid steps independent -> safe with "parallel" semantics.
    seed_u = seed_ref[0].astype(jnp.uint32)
    h = idx ^ (seed_u * jnp.uint32(0x9E3779B9))
    h = h ^ (h >> 16)
    h = h * jnp.uint32(0x85EBCA6B)
    h = h ^ (h >> 13)
    h = h * jnp.uint32(0xC2B2AE35)
    h = h ^ (h >> 16)

    # Integer-domain keep test: P(drop) = threshold / 2^32 ~= p.
    keep = h >= jnp.uint32(threshold)

    x = x_ref[...]
    scaled = x * jnp.asarray(scale, dtype=x.dtype)   # native-dtype compute (bf16 stays bf16)
    o_ref[...] = jnp.where(keep, scaled, jnp.zeros_like(x))


def dropout_layer(x, p=P_DROP, *, seed=0, training=True):
    """Matches F.dropout(x, p, training): zero w.p. p, scale kept by 1/(1-p)."""
    if (not training) or p == 0.0:
        return x

    orig_shape = x.shape
    total = int(x.size)
    lanes = _LANES
    rows = int(pl.cdiv(total, lanes))

    if rows <= _MAX_BLOCK_ROWS:
        block_rows = rows               # block == full array dims: always a legal tile
    else:
        block_rows = _MAX_BLOCK_ROWS    # multiple of 8 -> legal (8,128)-aligned tile
    rows_padded = int(pl.cdiv(rows, block_rows)) * block_rows
    padded_total = rows_padded * lanes

    flat = x.reshape(-1)
    if padded_total != total:
        flat = jnp.pad(flat, (0, padded_total - total))
    x2 = flat.reshape(rows_padded, lanes)

    grid = (rows_padded // block_rows,)
    seed_arr = jnp.array([seed], dtype=jnp.int32)
    threshold = int(round(float(p) * float(2 ** 32)))
    scale = 1.0 / (1.0 - float(p))

    out2 = pl.pallas_call(
        partial(_dropout_kernel, threshold=threshold, scale=scale,
                block_rows=block_rows, lanes=lanes),
        out_shape=jax.ShapeDtypeStruct((rows_padded, lanes), x.dtype),
        grid_spec=pltpu.PrefetchScalarGridSpec(
            num_scalar_prefetch=1,
            grid=grid,
            in_specs=[pl.BlockSpec((block_rows, lanes), lambda i, seed_ref: (i, 0))],
            out_specs=pl.BlockSpec((block_rows, lanes), lambda i, seed_ref: (i, 0)),
        ),
        compiler_params=pltpu.CompilerParams(
            # Stateless per-element hash -> steps independent -> megacore-shardable.
            dimension_semantics=("parallel",),
        ),
    )(seed_arr, x2)

    out_flat = out2.reshape(-1)
    if padded_total != total:
        out_flat = out_flat[:total]
    return out_flat.reshape(orig_shape)


if __name__ == "__main__":
    key = jax.random.PRNGKey(0)
    # Small NCHW input consistent with a conv-net dropout layer.
    x = jax.random.normal(key, (2, 4, 16, 16), dtype=jnp.float32)

    y = dropout_layer(x, P_DROP, seed=0, training=True)
    y = jax.block_until_ready(y)

    # Sanity: every output element is either 0 or x / (1 - p).
    scale = 1.0 / (1.0 - P_DROP)
    is_zero = y == 0.0
    is_scaled = jnp.isclose(y, x * scale, rtol=1e-6, atol=1e-6)
    assert bool(jnp.all(is_zero | is_scaled)), "dropout semantics violated"
    # Drop fraction should be roughly p.
    frac = float(jnp.mean(is_zero.astype(jnp.float32)))
    assert 0.15 < frac < 0.45, f"unexpected drop fraction {frac}"

    # Eval mode is identity.
    y_eval = dropout_layer(x, P_DROP, seed=0, training=False)
    assert bool(jnp.all(y_eval == x))

    print("KERNEL_OK")
</pallas_src>

<mosaic_0001>
module attributes {stable_mosaic.version = 11 : i64} {
  func.func @_dropout_kernel(%arg0: i32, %arg1: memref<1xi32, #tpu.memory_space<smem>>, %arg2: memref<4x512xf32, #tpu.memory_space<vmem>>, %arg3: memref<4x512xf32, #tpu.memory_space<vmem>>) attributes {dimension_semantics = [#tpu.dimension_semantics<parallel>], iteration_bounds = array<i64: 1>, scalar_prefetch = 1 : i64, scratch_operands = 0 : i64, tpu.core_type = #tpu.core_type<tc>, window_params = [{transform_indices = @transform_0, window_bounds = array<i64: 4, 512>}, {transform_indices = @transform_1, window_bounds = array<i64: 4, 512>}]} {
    %0 = tpu.iota {dimensions = array<i32: 0>} : vector<4x512xi32>
    %1 = tpu.iota {dimensions = array<i32: 1>} : vector<4x512xi32>
    %c4_i32 = arith.constant 4 : i32
    %2 = arith.muli %arg0, %c4_i32 : i32
    %3 = vector.broadcast %2 : i32 to vector<4x512xi32>
    %4 = arith.addi %3, %0 : vector<4x512xi32>
    %c512_i32 = arith.constant 512 : i32
    %5 = vector.broadcast %c512_i32 : i32 to vector<4x512xi32>
    %6 = arith.muli %4, %5 : vector<4x512xi32>
    %7 = arith.addi %6, %1 : vector<4x512xi32>
    %c0 = arith.constant 0 : index
    %8 = memref.load %arg1[%c0] : memref<1xi32, #tpu.memory_space<smem>>
    %c-1640531527_i32 = arith.constant -1640531527 : i32
    %9 = arith.muli %8, %c-1640531527_i32 : i32
    %10 = vector.broadcast %9 : i32 to vector<4x512xi32>
    %11 = arith.xori %7, %10 : vector<4x512xi32>
    %c16_i32 = arith.constant 16 : i32
    %12 = vector.broadcast %c16_i32 : i32 to vector<4x512xi32>
    %13 = arith.shrui %11, %12 : vector<4x512xi32>
    %14 = arith.xori %11, %13 : vector<4x512xi32>
    %c-2048144789_i32 = arith.constant -2048144789 : i32
    %15 = vector.broadcast %c-2048144789_i32 : i32 to vector<4x512xi32>
    %16 = arith.muli %14, %15 : vector<4x512xi32>
    %c13_i32 = arith.constant 13 : i32
    %17 = vector.broadcast %c13_i32 : i32 to vector<4x512xi32>
    %18 = arith.shrui %16, %17 : vector<4x512xi32>
    %19 = arith.xori %16, %18 : vector<4x512xi32>
    %c-1028477387_i32 = arith.constant -1028477387 : i32
    %20 = vector.broadcast %c-1028477387_i32 : i32 to vector<4x512xi32>
    %21 = arith.muli %19, %20 : vector<4x512xi32>
    %c16_i32_0 = arith.constant 16 : i32
    %22 = vector.broadcast %c16_i32_0 : i32 to vector<4x512xi32>
    %23 = arith.shrui %21, %22 : vector<4x512xi32>
    %24 = arith.xori %21, %23 : vector<4x512xi32>
    %c1288490189_i32 = arith.constant 1288490189 : i32
    %25 = vector.broadcast %c1288490189_i32 : i32 to vector<4x512xi32>
    %26 = arith.cmpi uge, %24, %25 : vector<4x512xi32>
    %c0_1 = arith.constant 0 : index
    %c0_2 = arith.constant 0 : index
    %27 = vector.load %arg2[%c0_1, %c0_2] : memref<4x512xf32, #tpu.memory_space<vmem>>, vector<4x512xf32>
    %cst = arith.constant 1.42857146 : f32
    %28 = vector.broadcast %cst : f32 to vector<4x512xf32>
    %29 = arith.mulf %27, %28 : vector<4x512xf32>
    %cst_3 = arith.constant 0.000000e+00 : f32
    %30 = vector.broadcast %cst_3 : f32 to vector<4x512xf32>
    %31 = arith.select %26, %29, %30 : vector<4x512xi1>, vector<4x512xf32>
    %c0_4 = arith.constant 0 : index
    %c0_5 = arith.constant 0 : index
    %32 = vector.load %arg3[%c0_4, %c0_5] : memref<4x512xf32, #tpu.memory_space<vmem>>, vector<4x512xf32>
    tpu.vector_store %arg3[%c0_4, %c0_5], %31 {strides = array<i32>} : memref<4x512xf32, #tpu.memory_space<vmem>>, vector<4x512xf32>,
    return
  }
  func.func @transform_0(%arg0: i32, %arg1: memref<1xi32, #tpu.memory_space<smem>>) -> (i32, i32) {
    %c0_i32 = arith.constant 0 : i32
    %c0_i32_0 = arith.constant 0 : i32
    return %arg0, %c0_i32 : i32, i32
  }
  func.func @transform_1(%arg0: i32, %arg1: memref<1xi32, #tpu.memory_space<smem>>) -> (i32, i32) {
    %c0_i32 = arith.constant 0 : i32
    %c0_i32_0 = arith.constant 0 : i32
    return %arg0, %c0_i32 : i32, i32
  }
}

</mosaic_0001>

<bundles_post_ra>
// kernel: tpu_custom_call.1
= control target key start
LH: loop header
LB: loop body
LE: loop exit
PB: predicated region body
PF: predicated region fallthrough
CT: control target
= control target key end

     0   :  { %8 = vsyncpa [#allocation5], 0  ;;  %s214_s0 = inlined_call_operand.<no memory space> [shape: s32[1], index: 0, kind: input, shape index: {}]   ;;  %s215_s1 = inlined_call_operand.hbm [shape: f32[4,512], index: 1, kind: input, shape index: {}]   ;;  %s216_s2 = inlined_call_operand.hbm [shape: f32[4,512], index: 2, kind: output, shape index: {}]  }
   0x1   :  { %9 = vsyncpa [#allocation6], 0  ;;  %s170_s9 = smov [#allocation4]   ;;  %s122_s13 = scalar_lea.hbm %s215_s1, 256 }
   0x2   :  { %s16_s10 = sshll.u32 %s170_s9, 4  ;;  %p123_p0 = scmp.ne.s32.totalorder %s215_s1, %s122_s13  ;;  %s17_s10 = int_to_ptr.vmem [resolvable:$true] %s16_s10 }
   0x3   :  { %p126_p1 = scmp.lt.u32.totalorder %s122_s13, %s215_s1 }
   0x5   :  { %p128_p2 = pnand %p126_p1, %p123_p0 }
   0x7   :  { %131 = shalt.err (!%p128_p2)
}
   0x8   :  { %s132_s18 = scalar_lea.vmem %s17_s10, 256  ;;  %p137_p4 = scmp.lt.s32.totalorder %s17_s10, %s17_s10 }
   0x9   :  { %p133_p3 = scmp.ne.s32.totalorder %s17_s10, %s132_s18  ;;  %p138_p5 = scmp.lt.s32.totalorder %s132_s18, %s132_s18 }
   0xb   :  { %p139_p6 = por %p138_p5, %p137_p4 }
   0xd   :  { %p140_p7 = pnand %p139_p6, %p133_p3 }
   0xf   :  { %143 = shalt.err (!%p140_p7)
}
  0x10   :  { %19 = dma.hbm_to_vmem [thread:$0]  %s215_s1, 256, %s17_s10, [#allocation5]  }
  0x11   :  { %166 = dma.done.wait [#allocation5], 256  }
  0x12   :  { %167 = vsyncadd [#allocation5], 4294967040  ;;  %v23_v0 = vlaneseq  ;;  %s39_s23 = smul.u32 2654435769, %s214_s0  ;;  %v81_v30 = vld [vmem:[#allocation4] sm:$0xff]  ;;  %v82_v33 = vld [vmem:[#allocation4 + $0x8] sm:$0xff] }
  0x13   :  { %v83_v36 = vmul.f32 1.4285715, %v81_v30  ;;  %v84_v41 = vmul.f32 1.4285715, %v82_v33  ;;  %s171_s0 = smov [#allocation7]  }
  0x14   :  { %v24_v1 = vshrl.u32 %v23_v0, 7  ;;  %v26_v2 = vand.u32 127, %v23_v0  ;;  %v40_v7 = vstv %s39_s23  ;;  %s111_s1 = sshll.u32 %s171_s0, 4  ;;  %s112_s1 = int_to_ptr.vmem [resolvable:$true] %s111_s1 }
  0x15   :  { %v87_v46 = vcombine.high %v83_v36, %v83_v36  ;;  %v88_v51 = vcombine.high %v84_v41, %v84_v41  ;;  %s144_s24 = scalar_lea.vmem %s112_s1, 256  ;;  %p149_p9 = scmp.lt.s32.totalorder %s112_s1, %s112_s1 }
  0x16   :  { %v27_v3 = vadd.s32 128, %v26_v2  ;;  %v33_v4 = vmul.u32 512, %v24_v1  ;;  %v28_v5 = vadd.s32 256, %v26_v2  ;;  %v29_v6 = vadd.s32 384, %v26_v2  ;;  %p145_p8 = scmp.ne.s32.totalorder %s112_s1, %s144_s24  ;;  %p150_p10 = scmp.lt.s32.totalorder %s144_s24, %s144_s24 }
  0x18   :  { %v34_v8 = vadd.s32 %v33_v4, %v26_v2  ;;  %v35_v9 = vadd.s32 %v33_v4, %v27_v3  ;;  %v36_v10 = vadd.s32 %v33_v4, %v28_v5  ;;  %v37_v11 = vadd.s32 %v33_v4, %v29_v6  ;;  %p151_p11 = por %p150_p10, %p149_p9 }
  0x1a   :  { %v41_v12 = vxor.u32 %v40_v7, %v34_v8  ;;  %v42_v13 = vxor.u32 %v40_v7, %v35_v9  ;;  %v43_v14 = vxor.u32 %v40_v7, %v36_v10  ;;  %v44_v15 = vxor.u32 %v40_v7, %v37_v11  ;;  %p152_p12 = pnand %p151_p11, %p145_p8 }
  0x1c   :  { %v45_v16 = vshrl.u32 %v41_v12, 16  ;;  %v46_v17 = vshrl.u32 %v42_v13, 16  ;;  %v47_v18 = vshrl.u32 %v43_v14, 16  ;;  %v48_v19 = vshrl.u32 %v44_v15, 16 }
  0x1e   :  { %v49_v20 = vxor.u32 %v45_v16, %v41_v12  ;;  %v50_v21 = vxor.u32 %v46_v17, %v42_v13  ;;  %v51_v22 = vxor.u32 %v47_v18, %v43_v14  ;;  %v52_v23 = vxor.u32 %v48_v19, %v44_v15 }
  0x20   :  { %v53_v24 = vmul.u32 2246822507, %v49_v20  ;;  %v54_v25 = vmul.u32 2246822507, %v50_v21 }
  0x21   :  { %v55_v26 = vmul.u32 2246822507, %v51_v22  ;;  %v56_v27 = vmul.u32 2246822507, %v52_v23 }
  0x22   :  { %v57_v28 = vshrl.u32 %v53_v24, 13  ;;  %v58_v29 = vshrl.u32 %v54_v25, 13 }
  0x23   :  { %v59_v31 = vshrl.u32 %v55_v26, 13  ;;  %v60_v32 = vshrl.u32 %v56_v27, 13 }
  0x24   :  { %v61_v34 = vxor.u32 %v57_v28, %v53_v24  ;;  %v62_v35 = vxor.u32 %v58_v29, %v54_v25 }
  0x25   :  { %v63_v37 = vxor.u32 %v59_v31, %v55_v26  ;;  %v64_v38 = vxor.u32 %v60_v32, %v56_v27 }
  0x26   :  { %v65_v39 = vmul.u32 3266489909, %v61_v34  ;;  %v66_v40 = vmul.u32 3266489909, %v62_v35 }
  0x27   :  { %v67_v42 = vmul.u32 3266489909, %v63_v37  ;;  %v68_v43 = vmul.u32 3266489909, %v64_v38 }
  0x28   :  { %v69_v44 = vshrl.u32 %v65_v39, 16  ;;  %v70_v45 = vshrl.u32 %v66_v40, 16 }
  0x29   :  { %v71_v47 = vshrl.u32 %v67_v42, 16  ;;  %v72_v48 = vshrl.u32 %v68_v43, 16 }
  0x2a   :  { %v73_v49 = vxor.u32 %v69_v44, %v65_v39  ;;  %v74_v50 = vxor.u32 %v70_v45, %v66_v40 }
  0x2b   :  { %v75_v52 = vxor.u32 %v71_v47, %v67_v42  ;;  %v76_v53 = vxor.u32 %v72_v48, %v68_v43 }
  0x2c   :  { %vm77_vm0 = vcmp.ge.u32.totalorder %v73_v49, 1288490189  ;;  %vm78_vm1 = vcmp.ge.u32.totalorder %v74_v50, 1288490189 }
  0x2d   :  { %v91_v54 = vsel %vm77_vm0, %v83_v36, 0.0  ;;  %v92_v55 = vsel %vm78_vm1, %v87_v46, 0.0  ;;  %vm79_vm2 = vcmp.ge.u32.totalorder %v75_v52, 1288490189  ;;  %vm80_vm3 = vcmp.ge.u32.totalorder %v76_v53, 1288490189 }
  0x2e   :  { %v99_v56 = vcombine.low %v91_v54, %v92_v55  ;;  %v93_v57 = vsel %vm79_vm2, %v84_v41, 0.0  ;;  %v94_v58 = vsel %vm80_vm3, %v88_v51, 0.0 }
  0x2f   :  { %v100_v59 = vcombine.low %v93_v57, %v94_v58 }
  0x30   :  { %103 = vst [vmem:[#allocation7] sm:$0xff] %v99_v56 }
  0x31   :  { %104 = vst [vmem:[#allocation7 + $0x8] sm:$0xff] %v100_v59 }
  0x32   :  { %155 = shalt.err (!%p152_p12)
}
  0x33   :  { %s156_s27 = scalar_lea.hbm %s216_s2, 256 }
  0x34   :  { %p157_p13 = scmp.ne.s32.totalorder %s216_s2, %s156_s27  ;;  %p160_p0 = scmp.lt.u32.totalorder %s156_s27, %s216_s2 }
  0x36   :  { %p162_p1 = pnand %p160_p0, %p157_p13 }
  0x38   :  { %165 = shalt.err (!%p162_p1)
}
  0x39   :  { %114 = dma.vmem_to_hbm [thread:$0]  %s112_s1, 256, %s216_s2, [#allocation6]  }
  0x3a   :  { %168 = dma.done.wait [#allocation6], 256  }
  0x3b   :  { %169 = vsyncadd [#allocation6], 4294967040 }
  0x3c   :  { %118 = vsyncpa [#allocation5], 1 }
  0x3d   :  { %119 = vsyncpa [#allocation6], 1 }

</bundles_post_ra>
